<compile_context>
chip_gen: v7x
topology: tpu7x:2x2x1
jax: 0.10.0
libtpu: 0.0.40
codegen_flags: <defaults>
</compile_context>

<pallas_src>
import jax
import jax.numpy as jnp
from jax.experimental import pallas as pl
from jax.experimental.pallas import tpu as pltpu

_LANE = 128


def _cdiv(a, b):
    return -(-a // b)


def discriminator_kernel(xt_ref, w1_ref, b1_ref, w2_ref, b2_ref, o_ref):
    # fc1 on the MXU, lane-dense: (H, D) @ (D, TB) -> (H, TB), f32 accumulation.
    h = jnp.dot(w1_ref[...], xt_ref[...], preferred_element_type=jnp.float32)
    h = h + b1_ref[...]                                   # (H, TB) + (H, 1) lane broadcast
    # LeakyReLU(0.2) on the VPU (lane-dense tile).
    h = jnp.where(h > 0, h, 0.2 * h)
    # fc2: VPU broadcast-multiply + sublane (XLU) reduction -> lane-dense (1, TB) logits.
    logit = jnp.sum(h * w2_ref[...], axis=0, keepdims=True) + b2_ref[0]
    # Exact sigmoid with a single EUP transcendental: sigmoid(z) = 0.5*(tanh(z/2)+1).
    o_ref[...] = (0.5 * (jnp.tanh(0.5 * logit) + 1.0)).astype(o_ref.dtype)


def _vmem_budget_bytes():
    # Size tiles against the actual chip: ~half of physical VMEM (leaves room for the
    # compiler's scratch, double buffers, and the other TC on v7x). Conservative fallback.
    try:
        cap = pltpu.get_tpu_info().vmem_capacity_bytes
        return int(min(cap // 2, 100 * 1024 * 1024))
    except Exception:
        return 40 * 1024 * 1024


def _choose_block_b(batch, input_dim, hidden_dim, *, elt_bytes,
                    max_tb=8192, vmem_budget_bytes=None):
    """Pick the batch tile (lane axis): as large as the VMEM budget allows.

    Accounting: resident single-buffered weights (W1 + b1 + w2) plus the DOUBLE-buffered
    streamed x tile and output tile per batch column.
    """
    if vmem_budget_bytes is None:
        vmem_budget_bytes = _vmem_budget_bytes()
    b_pad = _cdiv(batch, _LANE) * _LANE
    resident = hidden_dim * input_dim * elt_bytes + 2 * hidden_dim * 4
    per_col = 2 * input_dim * elt_bytes + 2 * 4           # 2x x-buffers + 2x out-buffers
    avail = max(vmem_budget_bytes - resident, _LANE * per_col)
    tb = min(max_tb, avail // per_col)
    tb = max(_LANE, (tb // _LANE) * _LANE)
    tb = min(tb, b_pad)
    # v7x megacore: ensure >= 2 parallel grid steps whenever the padded batch allows it.
    if b_pad // tb < 2 and b_pad >= 2 * _LANE:
        tb = _cdiv(_cdiv(b_pad, 2), _LANE) * _LANE
    return int(tb)


def discriminator_forward(x, w1, b1, w2, b2, *, block_b=None, use_bf16=True):
    """Params in PyTorch nn.Linear layout: w1 (H, D), b1 (H,), w2 (1, H), b2 (1,)."""
    B, D = x.shape
    H, D2 = w1.shape
    assert D2 == D and b1.shape == (H,) and w2.shape == (1, H) and b2.shape == (1,)

    mm_dtype = jnp.bfloat16 if use_bf16 else jnp.float32
    elt = jnp.dtype(mm_dtype).itemsize

    tb = block_b if block_b is not None else _choose_block_b(B, D, H, elt_bytes=elt)
    tb = max(_LANE, (int(tb) // _LANE) * _LANE)
    n_tiles = _cdiv(B, tb)
    b_pad = n_tiles * tb

    # Lane-dense layout plumbing: batch on the lane axis (wrapper-side transpose/pad).
    xt = x.T.astype(mm_dtype)                             # (D, B)
    if b_pad != B:
        xt = jnp.pad(xt, ((0, 0), (0, b_pad - B)))        # padded cols: harmless garbage
    w1m = w1.astype(mm_dtype)                             # (H, D), VMEM-resident
    b1c = b1.reshape(H, 1).astype(jnp.float32)
    w2c = w2.reshape(H, 1).astype(jnp.float32)
    b2s = b2.astype(jnp.float32)                          # 1D scalar in SMEM

    # Honest VMEM accounting + explicit limit (weights single-buffered, streams x2).
    resident = H * D * elt + 2 * H * 4
    streamed = 2 * D * tb * elt + 2 * tb * 4
    assert resident < 40 * 1024 * 1024, (
        "Resident W1 working set too large for v7x VMEM (64 MiB physical).")
    # TODO(synk): add an H-tiled reduction grid axis (pl.when init/finalize) for very large
    # hidden_dim instead of keeping W1 fully VMEM-resident.
    vmem_limit = int(min(max(resident + streamed + (4 << 20), 32 << 20), 96 << 20))

    def call(single_buffer_weights):
        res_kw = {"pipeline_mode": pl.Buffered(1)} if single_buffer_weights else {}
        return pl.pallas_call(
            discriminator_kernel,
            out_shape=jax.ShapeDtypeStruct((1, b_pad), jnp.float32),
            grid=(n_tiles,),
            in_specs=[
                pl.BlockSpec((D, tb), lambda i: (0, i)),                     # x^T streamed
                pl.BlockSpec((H, D), lambda i: (0, 0), **res_kw),            # W1 resident
                pl.BlockSpec((H, 1), lambda i: (0, 0), **res_kw),            # b1 resident
                pl.BlockSpec((H, 1), lambda i: (0, 0), **res_kw),            # w2 resident
                pl.BlockSpec(memory_space=pltpu.MemorySpace.SMEM),           # b2 scalar
            ],
            out_specs=pl.BlockSpec((1, tb), lambda i: (0, i)),               # lane-dense out
            compiler_params=pltpu.CompilerParams(
                dimension_semantics=("parallel",),        # batch grid sharded across TCs
                vmem_limit_bytes=vmem_limit,
            ),
        )(xt, w1m, b1c, w2c, b2s)

    try:
        out = call(True)        # single-buffer the grid-invariant weights
    except Exception:
        out = call(False)       # fallback if this lowering rejects pipeline_mode
    return out[0, :B].reshape(B, 1)


def init_params(key, input_dim, hidden_dim):
    """PyTorch nn.Linear-style init and layouts: weight (out, in), bias (out,)."""
    k1, k2, k3, k4 = jax.random.split(key, 4)
    bound1 = 1.0 / jnp.sqrt(input_dim)
    bound2 = 1.0 / jnp.sqrt(hidden_dim)
    w1 = jax.random.uniform(k1, (hidden_dim, input_dim), jnp.float32, -bound1, bound1)
    b1 = jax.random.uniform(k2, (hidden_dim,), jnp.float32, -bound1, bound1)
    w2 = jax.random.uniform(k3, (1, hidden_dim), jnp.float32, -bound2, bound2)
    b2 = jax.random.uniform(k4, (1,), jnp.float32, -bound2, bound2)
    return w1, b1, w2, b2


def _ref_forward(x, w1, b1, w2, b2, *, bf16):
    """Pure-JAX reference. bf16=True emulates the kernel's MXU input quantization."""
    if bf16:
        x = x.astype(jnp.bfloat16).astype(jnp.float32)
        w1 = w1.astype(jnp.bfloat16).astype(jnp.float32)
    h = x @ w1.T + b1[None, :]
    h = jnp.where(h > 0, h, 0.2 * h)
    return jax.nn.sigmoid(h @ w2.T + b2[None, :])


if __name__ == "__main__":
    input_dim, hidden_dim, batch = 16, 32, 20
    key = jax.random.PRNGKey(0)
    kx, kp = jax.random.split(key)
    x = jax.random.normal(kx, (batch, input_dim), jnp.float32)
    w1, b1, w2, b2 = init_params(kp, input_dim, hidden_dim)

    out_bf16 = discriminator_forward(x, w1, b1, w2, b2)                     # default path
    out_f32 = discriminator_forward(x, w1, b1, w2, b2, use_bf16=False)

    # Larger batch + forced small tile: exercises a 3-step parallel batch grid + tail pad.
    x_big = jax.random.normal(kx, (300, input_dim), jnp.float32)
    out_big = discriminator_forward(x_big, w1, b1, w2, b2, block_b=128)
    jax.block_until_ready((out_bf16, out_f32, out_big))

    ref_f32 = _ref_forward(x, w1, b1, w2, b2, bf16=False)
    ref_bf16 = _ref_forward(x, w1, b1, w2, b2, bf16=True)
    ref_big = _ref_forward(x_big, w1, b1, w2, b2, bf16=True)

    assert out_bf16.shape == (batch, 1)
    assert out_f32.shape == (batch, 1)
    assert out_big.shape == (300, 1)
    assert jnp.allclose(out_f32, ref_f32, atol=1e-4, rtol=1e-4)      # f32 path, exact sigmoid
    assert jnp.allclose(out_bf16, ref_bf16, atol=1e-4, rtol=1e-4)    # matched bf16 reference
    assert jnp.allclose(out_bf16, ref_f32, atol=2e-2, rtol=2e-2)     # bf16 vs full-f32
    assert jnp.allclose(out_big, ref_big, atol=1e-4, rtol=1e-4)

    print("KERNEL_OK")
</pallas_src>

<mosaic_0001>
module attributes {stable_mosaic.version = 11 : i64} {
  func.func @discriminator_kernel(%arg0: i32, %arg1: memref<16x128xbf16, #tpu.memory_space<vmem>>, %arg2: memref<32x16xbf16, #tpu.memory_space<vmem>>, %arg3: memref<32x1xf32, #tpu.memory_space<vmem>>, %arg4: memref<32x1xf32, #tpu.memory_space<vmem>>, %arg5: memref<1xf32, #tpu.memory_space<smem>>, %arg6: memref<1x128xf32, #tpu.memory_space<vmem>>) attributes {dimension_semantics = [#tpu.dimension_semantics<parallel>], iteration_bounds = array<i64: 1>, scalar_prefetch = 0 : i64, scratch_operands = 0 : i64, tpu.core_type = #tpu.core_type<tc>, window_params = [{transform_indices = @transform_0, window_bounds = array<i64: 16, 128>}, {pipeline_mode = #tpu.pipeline_mode<synchronous>, transform_indices = @transform_1, window_bounds = array<i64: 32, 16>}, {pipeline_mode = #tpu.pipeline_mode<synchronous>, transform_indices = @transform_2, window_bounds = array<i64: 32, 1>}, {pipeline_mode = #tpu.pipeline_mode<synchronous>, transform_indices = @transform_3, window_bounds = array<i64: 32, 1>}, {transform_indices = @transform_4, window_bounds = array<i64: 1>}, {transform_indices = @transform_5, window_bounds = array<i64: 1, 128>}]} {
    %c0 = arith.constant 0 : index
    %c0_0 = arith.constant 0 : index
    %0 = vector.load %arg2[%c0, %c0_0] : memref<32x16xbf16, #tpu.memory_space<vmem>>, vector<32x16xbf16>
    %c0_1 = arith.constant 0 : index
    %c0_2 = arith.constant 0 : index
    %1 = vector.load %arg1[%c0_1, %c0_2] : memref<16x128xbf16, #tpu.memory_space<vmem>>, vector<16x128xbf16>
    %cst = arith.constant dense<0.000000e+00> : vector<32x128xf32>
    %2 = tpu.matmul %0, %1, %cst {dimension_numbers = #tpu.dot_dimension_numbers<[1], [0], [0], [1], [0, 0, 1, 1], [], []>} : vector<32x16xbf16>, vector<16x128xbf16>, vector<32x128xf32> -> vector<32x128xf32>
    %c0_3 = arith.constant 0 : index
    %c0_4 = arith.constant 0 : index
    %3 = vector.load %arg3[%c0_3, %c0_4] : memref<32x1xf32, #tpu.memory_space<vmem>>, vector<32x1xf32>
    %4 = vector.broadcast %3 : vector<32x1xf32> to vector<32x128xf32>
    %5 = arith.addf %2, %4 : vector<32x128xf32>
    %cst_5 = arith.constant 0.000000e+00 : f32
    %6 = vector.broadcast %cst_5 : f32 to vector<32x128xf32>
    %7 = arith.cmpf ogt, %5, %6 : vector<32x128xf32>
    %cst_6 = arith.constant 2.000000e-01 : f32
    %8 = vector.broadcast %cst_6 : f32 to vector<32x128xf32>
    %9 = arith.mulf %8, %5 : vector<32x128xf32>
    %10 = arith.select %7, %5, %9 : vector<32x128xi1>, vector<32x128xf32>
    %c0_7 = arith.constant 0 : index
    %c0_8 = arith.constant 0 : index
    %11 = vector.load %arg4[%c0_7, %c0_8] : memref<32x1xf32, #tpu.memory_space<vmem>>, vector<32x1xf32>
    %12 = vector.broadcast %11 : vector<32x1xf32> to vector<32x128xf32>
    %13 = arith.mulf %10, %12 : vector<32x128xf32>
    %cst_9 = arith.constant dense<0.000000e+00> : vector<128xf32>
    %14 = vector.multi_reduction <add>, %13, %cst_9 [0] : vector<32x128xf32> to vector<128xf32>
    %15 = vector.shape_cast %14 : vector<128xf32> to vector<1x128xf32>
    %c0_10 = arith.constant 0 : index
    %16 = memref.load %arg5[%c0_10] : memref<1xf32, #tpu.memory_space<smem>>
    %17 = vector.broadcast %16 : f32 to vector<1x128xf32>
    %18 = arith.addf %15, %17 : vector<1x128xf32>
    %cst_11 = arith.constant 5.000000e-01 : f32
    %19 = vector.broadcast %cst_11 : f32 to vector<1x128xf32>
    %20 = arith.mulf %19, %18 : vector<1x128xf32>
    %21 = math.tanh %20 : vector<1x128xf32>
    %cst_12 = arith.constant 1.000000e+00 : f32
    %22 = vector.broadcast %cst_12 : f32 to vector<1x128xf32>
    %23 = arith.addf %21, %22 : vector<1x128xf32>
    %cst_13 = arith.constant 5.000000e-01 : f32
    %24 = vector.broadcast %cst_13 : f32 to vector<1x128xf32>
    %25 = arith.mulf %24, %23 : vector<1x128xf32>
    %c0_14 = arith.constant 0 : index
    %c0_15 = arith.constant 0 : index
    %26 = vector.load %arg6[%c0_14, %c0_15] : memref<1x128xf32, #tpu.memory_space<vmem>>, vector<1x128xf32>
    tpu.vector_store %arg6[%c0_14, %c0_15], %25 {strides = array<i32>} : memref<1x128xf32, #tpu.memory_space<vmem>>, vector<1x128xf32>,
    return
  }
  func.func @transform_0(%arg0: i32) -> (i32, i32) {
    %c0_i32 = arith.constant 0 : i32
    %c0_i32_0 = arith.constant 0 : i32
    return %c0_i32, %arg0 : i32, i32
  }
  func.func @transform_1(%arg0: i32) -> (i32, i32) {
    %c0_i32 = arith.constant 0 : i32
    %c0_i32_0 = arith.constant 0 : i32
    %c0_i32_1 = arith.constant 0 : i32
    return %c0_i32, %c0_i32_0 : i32, i32
  }
  func.func @transform_2(%arg0: i32) -> (i32, i32) {
    %c0_i32 = arith.constant 0 : i32
    %c0_i32_0 = arith.constant 0 : i32
    %c0_i32_1 = arith.constant 0 : i32
    return %c0_i32, %c0_i32_0 : i32, i32
  }
  func.func @transform_3(%arg0: i32) -> (i32, i32) {
    %c0_i32 = arith.constant 0 : i32
    %c0_i32_0 = arith.constant 0 : i32
    %c0_i32_1 = arith.constant 0 : i32
    return %c0_i32, %c0_i32_0 : i32, i32
  }
  func.func @transform_4(%arg0: i32) -> i32 {
    %c0_i32 = arith.constant 0 : i32
    %c0_i32_0 = arith.constant 0 : i32
    return %c0_i32 : i32
  }
  func.func @transform_5(%arg0: i32) -> (i32, i32) {
    %c0_i32 = arith.constant 0 : i32
    %c0_i32_0 = arith.constant 0 : i32
    return %c0_i32, %arg0 : i32, i32
  }
}

module attributes {stable_mosaic.version = 11 : i64} {
  func.func @discriminator_kernel(%arg0: i32, %arg1: memref<16x128xbf16, #tpu.memory_space<vmem>>, %arg2: memref<32x16xbf16, #tpu.memory_space<vmem>>, %arg3: memref<32x1xf32, #tpu.memory_space<vmem>>, %arg4: memref<32x1xf32, #tpu.memory_space<vmem>>, %arg5: memref<1xf32, #tpu.memory_space<smem>>, %arg6: memref<1x128xf32, #tpu.memory_space<vmem>>) attributes {dimension_semantics = [#tpu.dimension_semantics<parallel>], iteration_bounds = array<i64: 1>, scalar_prefetch = 0 : i64, scratch_operands = 0 : i64, tpu.core_type = #tpu.core_type<tc>, window_params = [{transform_indices = @transform_0, window_bounds = array<i64: 16, 128>}, {pipeline_mode = #tpu.pipeline_mode<synchronous>, transform_indices = @transform_1, window_bounds = array<i64: 32, 16>}, {pipeline_mode = #tpu.pipeline_mode<synchronous>, transform_indices = @transform_2, window_bounds = array<i64: 32, 1>}, {pipeline_mode = #tpu.pipeline_mode<synchronous>, transform_indices = @transform_3, window_bounds = array<i64: 32, 1>}, {transform_indices = @transform_4, window_bounds = array<i64: 1>}, {transform_indices = @transform_5, window_bounds = array<i64: 1, 128>}]} {
    %c0 = arith.constant 0 : index
    %c0_0 = arith.constant 0 : index
    %0 = vector.load %arg2[%c0, %c0_0] : memref<32x16xbf16, #tpu.memory_space<vmem>>, vector<32x16xbf16>
    %c0_1 = arith.constant 0 : index
    %c0_2 = arith.constant 0 : index
    %1 = vector.load %arg1[%c0_1, %c0_2] : memref<16x128xbf16, #tpu.memory_space<vmem>>, vector<16x128xbf16>
    %cst = arith.constant dense<0.000000e+00> : vector<32x128xf32>
    %2 = tpu.matmul %0, %1, %cst {dimension_numbers = #tpu.dot_dimension_numbers<[1], [0], [0], [1], [0, 0, 1, 1], [], []>} : vector<32x16xbf16>, vector<16x128xbf16>, vector<32x128xf32> -> vector<32x128xf32>
    %c0_3 = arith.constant 0 : index
    %c0_4 = arith.constant 0 : index
    %3 = vector.load %arg3[%c0_3, %c0_4] : memref<32x1xf32, #tpu.memory_space<vmem>>, vector<32x1xf32>
    %4 = vector.broadcast %3 : vector<32x1xf32> to vector<32x128xf32>
    %5 = arith.addf %2, %4 : vector<32x128xf32>
    %cst_5 = arith.constant 0.000000e+00 : f32
    %6 = vector.broadcast %cst_5 : f32 to vector<32x128xf32>
    %7 = arith.cmpf ogt, %5, %6 : vector<32x128xf32>
    %cst_6 = arith.constant 2.000000e-01 : f32
    %8 = vector.broadcast %cst_6 : f32 to vector<32x128xf32>
    %9 = arith.mulf %8, %5 : vector<32x128xf32>
    %10 = arith.select %7, %5, %9 : vector<32x128xi1>, vector<32x128xf32>
    %c0_7 = arith.constant 0 : index
    %c0_8 = arith.constant 0 : index
    %11 = vector.load %arg4[%c0_7, %c0_8] : memref<32x1xf32, #tpu.memory_space<vmem>>, vector<32x1xf32>
    %12 = vector.broadcast %11 : vector<32x1xf32> to vector<32x128xf32>
    %13 = arith.mulf %10, %12 : vector<32x128xf32>
    %cst_9 = arith.constant dense<0.000000e+00> : vector<128xf32>
    %14 = vector.multi_reduction <add>, %13, %cst_9 [0] : vector<32x128xf32> to vector<128xf32>
    %15 = vector.shape_cast %14 : vector<128xf32> to vector<1x128xf32>
    %c0_10 = arith.constant 0 : index
    %16 = memref.load %arg5[%c0_10] : memref<1xf32, #tpu.memory_space<smem>>
    %17 = vector.broadcast %16 : f32 to vector<1x128xf32>
    %18 = arith.addf %15, %17 : vector<1x128xf32>
    %cst_11 = arith.constant 5.000000e-01 : f32
    %19 = vector.broadcast %cst_11 : f32 to vector<1x128xf32>
    %20 = arith.mulf %19, %18 : vector<1x128xf32>
    %21 = math.tanh %20 : vector<1x128xf32>
    %cst_12 = arith.constant 1.000000e+00 : f32
    %22 = vector.broadcast %cst_12 : f32 to vector<1x128xf32>
    %23 = arith.addf %21, %22 : vector<1x128xf32>
    %cst_13 = arith.constant 5.000000e-01 : f32
    %24 = vector.broadcast %cst_13 : f32 to vector<1x128xf32>
    %25 = arith.mulf %24, %23 : vector<1x128xf32>
    %c0_14 = arith.constant 0 : index
    %c0_15 = arith.constant 0 : index
    %26 = vector.load %arg6[%c0_14, %c0_15] : memref<1x128xf32, #tpu.memory_space<vmem>>, vector<1x128xf32>
    tpu.vector_store %arg6[%c0_14, %c0_15], %25 {strides = array<i32>} : memref<1x128xf32, #tpu.memory_space<vmem>>, vector<1x128xf32>,
    return
  }
  func.func @transform_0(%arg0: i32) -> (i32, i32) {
    %c0_i32 = arith.constant 0 : i32
    %c0_i32_0 = arith.constant 0 : i32
    return %c0_i32, %arg0 : i32, i32
  }
  func.func @transform_1(%arg0: i32) -> (i32, i32) {
    %c0_i32 = arith.constant 0 : i32
    %c0_i32_0 = arith.constant 0 : i32
    %c0_i32_1 = arith.constant 0 : i32
    return %c0_i32, %c0_i32_0 : i32, i32
  }
  func.func @transform_2(%arg0: i32) -> (i32, i32) {
    %c0_i32 = arith.constant 0 : i32
    %c0_i32_0 = arith.constant 0 : i32
    %c0_i32_1 = arith.constant 0 : i32
    return %c0_i32, %c0_i32_0 : i32, i32
  }
  func.func @transform_3(%arg0: i32) -> (i32, i32) {
    %c0_i32 = arith.constant 0 : i32
    %c0_i32_0 = arith.constant 0 : i32
    %c0_i32_1 = arith.constant 0 : i32
    return %c0_i32, %c0_i32_0 : i32, i32
  }
  func.func @transform_4(%arg0: i32) -> i32 {
    %c0_i32 = arith.constant 0 : i32
    %c0_i32_0 = arith.constant 0 : i32
    return %c0_i32 : i32
  }
  func.func @transform_5(%arg0: i32) -> (i32, i32) {
    %c0_i32 = arith.constant 0 : i32
    %c0_i32_0 = arith.constant 0 : i32
    return %c0_i32, %arg0 : i32, i32
  }
}

</mosaic_0001>

<bundles_post_ra>
// kernel: tpu_custom_call.1
= control target key start
LH: loop header
LB: loop body
LE: loop exit
PB: predicated region body
PF: predicated region fallthrough
CT: control target
= control target key end

     0   :  { %vm69_vm0 = vcmask 130048   ;;  %v243_v3 = vmov 0   ;;  %s323_s0 = inlined_call_operand.vmem [shape: bf16[16,128], index: 0, kind: input, shape index: {}]   ;;  %s324_s1 = inlined_call_operand.vmem [shape: bf16[32,16], index: 1, kind: input, shape index: {}]   ;;  %s325_s2 = inlined_call_operand.vmem [shape: f32[32,1], index: 2, kind: input, shape index: {}]   ;;  %s326_s3 = inlined_call_operand.vmem [shape: f32[32,1], index: 3, kind: input, shape index: {}]   ;;  %s327_s4 = inlined_call_operand.<no memory space> [shape: f32[1], index: 4, kind: input, shape index: {}]   ;;  %s328_s5 = inlined_call_operand.hbm [shape: f32[1,128], index: 5, kind: output, shape index: {}]  }
   0x1   :  { %v214_v0 = vld [vmem:[%s323_s0] sm:$0xff]   ;;  %v216_v2 = vld [vmem:[%s324_s1 + $0x8] sm:$0xff]   ;;  %212 = vset.pattern.permute.xlu0 %v243_v3  ;;  %v31_v5 = vld [vmem:[%s325_s2 + $0x10] sm:$0xff]  ;;  %213 = vset.pattern.permute.xlu1 %v243_v3 }
   0x2   :  { %v215_v1 = vld [vmem:[%s324_s1] sm:$0xff]   ;;  %204 = vmatprep.subr.bf16.mxu0 %v214_v0  ;;  %45 = vperm.xlu1 %213, %v31_v5   ;;  %v30_v6 = vld [vmem:[%s325_s2 + $0x8] sm:$0xff] }
   0x3   :  { %205 = vmatpush3.bf16.msra.mxu0 %v214_v0  ;;  %206 = vmatprep.mubr.msk.bf16.mxu0 %vm69_vm0, %v215_v1  ;;  %v29_v4 = vld [vmem:[%s325_s2] sm:$0xff] }
   0x4   :  { %35 = vperm.xlu0 %212, %v29_v4  }
   0x5   :  { %11 = vsyncpa [#allocation4], 0  ;;  %v32_v7 = vld [vmem:[%s325_s2 + $0x18] sm:$0xff]  ;;  %v137_v8 = vld [vmem:[%s326_s3] sm:$0xff]  ;;  %v175_v48 = vstv %s327_s4  ;;  %s244_s13 = smov [#allocation3]  }
   0x6   :  { %207 = vmatmul.mubr.msk.bf16.vlgmr.msra.gmra.mrb[0].mxu0 %vm69_vm0, %v216_v2  ;;  %50 = vperm.xlu1 %213, %v32_v7   ;;  %v138_v9 = vld [vmem:[%s326_s3 + $0x8] sm:$0xff]  ;;  %v139_v10 = vld [vmem:[%s326_s3 + $0x10] sm:$0xff]  ;;  %v140_v11 = vld [vmem:[%s326_s3 + $0x18] sm:$0xff]  ;;  %s188_s14 = sshll.u32 %s244_s13, 4  ;;  %s189_s14 = int_to_ptr.vmem [resolvable:$true] %s188_s14 }
   0x7   :  { %s219_s15 = scalar_lea.vmem %s189_s14, 16  ;;  %s223_s16 = scalar_lea.vmem %s189_s14, 32 }
   0x8   :  { %40 = vperm.xlu0 %212, %v30_v6   ;;  %p220_p0 = scmp.ne.s32.totalorder %s189_s14, %s219_s15  ;;  %p224_p1 = scmp.lt.s32.totalorder %s189_s14, %s189_s14 }
   0x9   :  { %p225_p2 = scmp.lt.s32.totalorder %s223_s16, %s219_s15 }
   0xa   :  { %148 = vperm.xlu1 %213, %v138_v9  }
   0xb   :  { %p226_p3 = por %p225_p2, %p224_p1 }
   0xc   :  { %143 = vperm.xlu0 %212, %v137_v8  }
   0xd   :  { %p227_p4 = pnand %p226_p3, %p220_p0 }
   0xe   :  { %158 = vperm.xlu1 %213, %v140_v11  }
  0x10   :  { %153 = vperm.xlu0 %212, %v139_v10  }
  0x81   :  { %v46_v13 = vpop.permute.xlu1 %45 }
  0x83   :  { %v36_v12 = vpop.permute.xlu0 %35 }
  0x85   :  { %v51_v15 = vpop.permute.xlu1 %50 }
  0x87   :  { %v41_v14 = vpop.permute.xlu0 %40 }
  0x89   :  { %v149_v27 = vpop.permute.xlu1 %148 }
  0x8b   :  { %v144_v23 = vpop.permute.xlu0 %143 }
  0x8d   :  { %v159_v39 = vpop.permute.xlu1 %158 }
  0x8f   :  { %v154_v35 = vpop.permute.xlu0 %153 }
  0xd9   :  { %v208_v16 = vpop.f32.mrb[0].mxu0 }
  0xda   :  { %v119_v17 = vadd.f32 %v208_v16, %v46_v13  ;;  %v110_v18 = vpop.f32.mrb[1].mxu0 }
  0xdb   :  { %v111_v19 = vadd.f32 %v110_v18, %v36_v12  ;;  %v209_v20 = vpop.f32.mrb[2].mxu0 }
  0xdc   :  { %v122_v21 = vadd.f32 %v209_v20, %v51_v15  ;;  %v113_v22 = vpop.f32.mrb[3].mxu0  ;;  %v131_v24 = vmul.f32 0.2, %v119_v17  ;;  %vm127_vm2 = vcmp.gt.f32.partialorder %v119_v17, 0.0 }
  0xdd   :  { %vm125_vm1 = vcmp.gt.f32.partialorder %v111_v19, 0.0  ;;  %v129_v25 = vmul.f32 0.2, %v111_v19  ;;  %v114_v26 = vadd.f32 %v113_v22, %v41_v14 }
  0xde   :  { %v132_v29 = vmul.f32 0.2, %v122_v21  ;;  %vm128_vm4 = vcmp.gt.f32.partialorder %v122_v21, 0.0  ;;  %v135_v31 = vsel %vm127_vm2, %v119_v17, %v131_v24 }
  0xdf   :  { %v133_v28 = vsel %vm125_vm1, %v111_v19, %v129_v25  ;;  %vm126_vm3 = vcmp.gt.f32.partialorder %v114_v26, 0.0  ;;  %v130_v30 = vmul.f32 0.2, %v114_v26  ;;  %v163_v37 = vmul.f32 %v154_v35, %v135_v31 }
  0xe0   :  { %v161_v33 = vmul.f32 %v144_v23, %v133_v28  ;;  %v136_v36 = vsel %vm128_vm4, %v122_v21, %v132_v29 }
  0xe1   :  { %v134_v32 = vsel %vm126_vm3, %v114_v26, %v130_v30  ;;  %v164_v40 = vmul.f32 %v159_v39, %v136_v36 }
  0xe2   :  { %v162_v34 = vmul.f32 %v149_v27, %v134_v32 }
  0xe4   :  { %v165_v38 = vadd.f32 %v162_v34, %v161_v33 }
  0xe6   :  { %v166_v41 = vadd.f32 %v165_v38, %v163_v37 }
  0xe8   :  { %v167_v42 = vadd.f32 %v166_v41, %v164_v40 }
  0xea   :  { %v168_v43 = vrot.slane %v167_v42, 4 }
  0xec   :  { %v169_v44 = vadd.f32 %v168_v43, %v167_v42 }
  0xee   :  { %v170_v45 = vrot.slane %v169_v44, 2 }
  0xf0   :  { %v171_v46 = vadd.f32 %v170_v45, %v169_v44 }
  0xf2   :  { %v172_v47 = vrot.slane %v171_v46, 1 }
  0xf4   :  { %v173_v49 = vadd.f32 %v172_v47, %v171_v46 }
  0xf6   :  { %v176_v50 = vadd.f32 %v175_v48, %v173_v49 }
  0xf8   :  { %v177_v51 = vmul.f32 0.5, %v176_v50 }
  0xfa   :  { %217 = vtanh.f32 %v177_v51 }
 0x104   :  { %v218_v52 = vpop.eup %217 }
 0x105   :  { %v179_v53 = vadd.f32 1.0, %v218_v52 }
 0x107   :  { %v180_v54 = vmul.f32 0.5, %v179_v53 }
 0x109   :  { %181 = vst [vmem:[#allocation3] sm:$0x1] %v180_v54 }
 0x10a   :  { %230 = shalt.err (!%p227_p4)
}
 0x10b   :  { %s231_s18 = scalar_lea.hbm %s328_s5, 16 }
 0x10c   :  { %p232_p5 = scmp.ne.s32.totalorder %s328_s5, %s231_s18  ;;  %p235_p6 = scmp.lt.u32.totalorder %s231_s18, %s328_s5 }
 0x10e   :  { %p237_p7 = pnand %p235_p6, %p232_p5 }
 0x110   :  { %240 = shalt.err (!%p237_p7)
}
 0x111   :  { %191 = dma.vmem_to_hbm [thread:$0]  %s189_s14, 16, %s328_s5, [#allocation4]  }
 0x112   :  { %241 = dma.done.wait [#allocation4], 16  }
 0x113   :  { %242 = vsyncadd [#allocation4], 4294967280 }
 0x114   :  { %195 = vsyncpa [#allocation4], 1 }

// kernel: tpu_custom_call.1
= control target key start
LH: loop header
LB: loop body
LE: loop exit
PB: predicated region body
PF: predicated region fallthrough
CT: control target
= control target key end

     0   :  { %vm69_vm0 = vcmask 130048   ;;  %v243_v3 = vmov 0   ;;  %s323_s0 = inlined_call_operand.vmem [shape: bf16[16,128], index: 0, kind: input, shape index: {}]   ;;  %s324_s1 = inlined_call_operand.vmem [shape: bf16[32,16], index: 1, kind: input, shape index: {}]   ;;  %s325_s2 = inlined_call_operand.vmem [shape: f32[32,1], index: 2, kind: input, shape index: {}]   ;;  %s326_s3 = inlined_call_operand.vmem [shape: f32[32,1], index: 3, kind: input, shape index: {}]   ;;  %s327_s4 = inlined_call_operand.<no memory space> [shape: f32[1], index: 4, kind: input, shape index: {}]   ;;  %s328_s5 = inlined_call_operand.hbm [shape: f32[1,128], index: 5, kind: output, shape index: {}]  }
   0x1   :  { %v214_v0 = vld [vmem:[%s323_s0] sm:$0xff]   ;;  %v216_v2 = vld [vmem:[%s324_s1 + $0x8] sm:$0xff]   ;;  %212 = vset.pattern.permute.xlu0 %v243_v3  ;;  %v31_v5 = vld [vmem:[%s325_s2 + $0x10] sm:$0xff]  ;;  %213 = vset.pattern.permute.xlu1 %v243_v3 }
   0x2   :  { %v215_v1 = vld [vmem:[%s324_s1] sm:$0xff]   ;;  %204 = vmatprep.subr.bf16.mxu0 %v214_v0  ;;  %45 = vperm.xlu1 %213, %v31_v5   ;;  %v30_v6 = vld [vmem:[%s325_s2 + $0x8] sm:$0xff] }
   0x3   :  { %205 = vmatpush3.bf16.msra.mxu0 %v214_v0  ;;  %206 = vmatprep.mubr.msk.bf16.mxu0 %vm69_vm0, %v215_v1  ;;  %v29_v4 = vld [vmem:[%s325_s2] sm:$0xff] }
   0x4   :  { %35 = vperm.xlu0 %212, %v29_v4  }
   0x5   :  { %11 = vsyncpa [#allocation4], 0  ;;  %v32_v7 = vld [vmem:[%s325_s2 + $0x18] sm:$0xff]  ;;  %v137_v8 = vld [vmem:[%s326_s3] sm:$0xff]  ;;  %v175_v48 = vstv %s327_s4  ;;  %s244_s13 = smov [#allocation3]  }
   0x6   :  { %207 = vmatmul.mubr.msk.bf16.vlgmr.msra.gmra.mrb[0].mxu0 %vm69_vm0, %v216_v2  ;;  %50 = vperm.xlu1 %213, %v32_v7   ;;  %v138_v9 = vld [vmem:[%s326_s3 + $0x8] sm:$0xff]  ;;  %v139_v10 = vld [vmem:[%s326_s3 + $0x10] sm:$0xff]  ;;  %v140_v11 = vld [vmem:[%s326_s3 + $0x18] sm:$0xff]  ;;  %s188_s14 = sshll.u32 %s244_s13, 4  ;;  %s189_s14 = int_to_ptr.vmem [resolvable:$true] %s188_s14 }
   0x7   :  { %s219_s15 = scalar_lea.vmem %s189_s14, 16  ;;  %s223_s16 = scalar_lea.vmem %s189_s14, 32 }
   0x8   :  { %40 = vperm.xlu0 %212, %v30_v6   ;;  %p220_p0 = scmp.ne.s32.totalorder %s189_s14, %s219_s15  ;;  %p224_p1 = scmp.lt.s32.totalorder %s189_s14, %s189_s14 }
   0x9   :  { %p225_p2 = scmp.lt.s32.totalorder %s223_s16, %s219_s15 }
   0xa   :  { %148 = vperm.xlu1 %213, %v138_v9  }
   0xb   :  { %p226_p3 = por %p225_p2, %p224_p1 }
   0xc   :  { %143 = vperm.xlu0 %212, %v137_v8  }
   0xd   :  { %p227_p4 = pnand %p226_p3, %p220_p0 }
   0xe   :  { %158 = vperm.xlu1 %213, %v140_v11  }
  0x10   :  { %153 = vperm.xlu0 %212, %v139_v10  }
  0x81   :  { %v46_v13 = vpop.permute.xlu1 %45 }
  0x83   :  { %v36_v12 = vpop.permute.xlu0 %35 }
  0x85   :  { %v51_v15 = vpop.permute.xlu1 %50 }
  0x87   :  { %v41_v14 = vpop.permute.xlu0 %40 }
  0x89   :  { %v149_v27 = vpop.permute.xlu1 %148 }
  0x8b   :  { %v144_v23 = vpop.permute.xlu0 %143 }
  0x8d   :  { %v159_v39 = vpop.permute.xlu1 %158 }
  0x8f   :  { %v154_v35 = vpop.permute.xlu0 %153 }
  0xd9   :  { %v208_v16 = vpop.f32.mrb[0].mxu0 }
  0xda   :  { %v119_v17 = vadd.f32 %v208_v16, %v46_v13  ;;  %v110_v18 = vpop.f32.mrb[1].mxu0 }
  0xdb   :  { %v111_v19 = vadd.f32 %v110_v18, %v36_v12  ;;  %v209_v20 = vpop.f32.mrb[2].mxu0 }
  0xdc   :  { %v122_v21 = vadd.f32 %v209_v20, %v51_v15  ;;  %v113_v22 = vpop.f32.mrb[3].mxu0  ;;  %v131_v24 = vmul.f32 0.2, %v119_v17  ;;  %vm127_vm2 = vcmp.gt.f32.partialorder %v119_v17, 0.0 }
  0xdd   :  { %vm125_vm1 = vcmp.gt.f32.partialorder %v111_v19, 0.0  ;;  %v129_v25 = vmul.f32 0.2, %v111_v19  ;;  %v114_v26 = vadd.f32 %v113_v22, %v41_v14 }
  0xde   :  { %v132_v29 = vmul.f32 0.2, %v122_v21  ;;  %vm128_vm4 = vcmp.gt.f32.partialorder %v122_v21, 0.0  ;;  %v135_v31 = vsel %vm127_vm2, %v119_v17, %v131_v24 }
  0xdf   :  { %v133_v28 = vsel %vm125_vm1, %v111_v19, %v129_v25  ;;  %vm126_vm3 = vcmp.gt.f32.partialorder %v114_v26, 0.0  ;;  %v130_v30 = vmul.f32 0.2, %v114_v26  ;;  %v163_v37 = vmul.f32 %v154_v35, %v135_v31 }
  0xe0   :  { %v161_v33 = vmul.f32 %v144_v23, %v133_v28  ;;  %v136_v36 = vsel %vm128_vm4, %v122_v21, %v132_v29 }
  0xe1   :  { %v134_v32 = vsel %vm126_vm3, %v114_v26, %v130_v30  ;;  %v164_v40 = vmul.f32 %v159_v39, %v136_v36 }
  0xe2   :  { %v162_v34 = vmul.f32 %v149_v27, %v134_v32 }
  0xe4   :  { %v165_v38 = vadd.f32 %v162_v34, %v161_v33 }
  0xe6   :  { %v166_v41 = vadd.f32 %v165_v38, %v163_v37 }
  0xe8   :  { %v167_v42 = vadd.f32 %v166_v41, %v164_v40 }
  0xea   :  { %v168_v43 = vrot.slane %v167_v42, 4 }
  0xec   :  { %v169_v44 = vadd.f32 %v168_v43, %v167_v42 }
  0xee   :  { %v170_v45 = vrot.slane %v169_v44, 2 }
  0xf0   :  { %v171_v46 = vadd.f32 %v170_v45, %v169_v44 }
  0xf2   :  { %v172_v47 = vrot.slane %v171_v46, 1 }
  0xf4   :  { %v173_v49 = vadd.f32 %v172_v47, %v171_v46 }
  0xf6   :  { %v176_v50 = vadd.f32 %v175_v48, %v173_v49 }
  0xf8   :  { %v177_v51 = vmul.f32 0.5, %v176_v50 }
  0xfa   :  { %217 = vtanh.f32 %v177_v51 }
 0x104   :  { %v218_v52 = vpop.eup %217 }
 0x105   :  { %v179_v53 = vadd.f32 1.0, %v218_v52 }
 0x107   :  { %v180_v54 = vmul.f32 0.5, %v179_v53 }
 0x109   :  { %181 = vst [vmem:[#allocation3] sm:$0x1] %v180_v54 }
 0x10a   :  { %230 = shalt.err (!%p227_p4)
}
 0x10b   :  { %s231_s18 = scalar_lea.hbm %s328_s5, 16 }
 0x10c   :  { %p232_p5 = scmp.ne.s32.totalorder %s328_s5, %s231_s18  ;;  %p235_p6 = scmp.lt.u32.totalorder %s231_s18, %s328_s5 }
 0x10e   :  { %p237_p7 = pnand %p235_p6, %p232_p5 }
 0x110   :  { %240 = shalt.err (!%p237_p7)
}
 0x111   :  { %191 = dma.vmem_to_hbm [thread:$0]  %s189_s14, 16, %s328_s5, [#allocation4]  }
 0x112   :  { %241 = dma.done.wait [#allocation4], 16  }
 0x113   :  { %242 = vsyncadd [#allocation4], 4294967280 }
 0x114   :  { %195 = vsyncpa [#allocation4], 1 }

</bundles_post_ra>
